<compile_context>
chip_gen: v6e
topology: v6e:2x2x1
jax: 0.10.0
libtpu: 0.0.40
codegen_flags: <defaults>
</compile_context>

<pallas_src>
import jax
import jax.numpy as jnp
from jax import lax
from jax.experimental import pallas as pl
from jax.experimental.pallas import tpu as pltpu


def _round_up(n, m):
    return ((n + m - 1) // m) * m


def bert_pooler_kernel(cls_ref, w_ref, b_ref, o_ref):
    # cls_ref: (tb, Hp)   CLS-token tile, compute dtype (bf16)
    # w_ref:   (Hp, Hp)   weight in (out_features, in_features) layout, bf16
    # b_ref:   (1, Hp)    bias, f32
    # o_ref:   (tb, Hp)   output tile
    y = lax.dot_general(
        cls_ref[...], w_ref[...],
        dimension_numbers=(((1,), (1,)), ((), ())),   # contract in_features (== x @ W^T)
        preferred_element_type=jnp.float32,           # f32 accumulate on the MXU
    )
    y = y + b_ref[...]                                # f32 bias add (VPU)
    o_ref[...] = jnp.tanh(y).astype(o_ref.dtype)      # tanh (EUP), lane-dense store


def bert_pooler(x, weight, bias, *, block_b=256, compute_dtype=jnp.bfloat16):
    """x: (B, S, H); weight: (H_out, H_in) like nn.Linear; bias: (H_out,)."""
    B, S, H = x.shape
    out_dtype = x.dtype

    # --- pool the CLS token BEFORE the kernel: HBM traffic is B*H, not B*S*H.
    cls = x[:, 0, :]                                  # (B, H)

    # --- hardware-friendly padding: lanes (128) on H, sublanes on the batch tile.
    cbytes = jnp.dtype(compute_dtype).itemsize
    obytes = jnp.dtype(out_dtype).itemsize
    sub = 8 * (4 // cbytes)                           # 8 sublanes f32, 16 for bf16
    Hp = _round_up(H, 128)
    tb = max(sub, min(block_b, _round_up(B, sub)))
    Bp = _round_up(B, tb)

    # In production the weight would already live in bf16; the cast here is a
    # one-time (constant-foldable under jit) conversion, and halves weight DMA.
    cls_p = jnp.pad(cls.astype(compute_dtype), ((0, Bp - B), (0, Hp - H)))
    w_p = jnp.pad(weight.astype(compute_dtype), ((0, Hp - H), (0, Hp - H)))
    b_p = jnp.pad(bias.astype(jnp.float32), (0, Hp - H)).reshape(1, Hp)

    grid = (Bp // tb,)

    # --- explicit VMEM budget (double-buffered inputs/outputs + resident weight).
    vmem_est = (2 * tb * Hp * cbytes        # CLS tiles
                + 2 * Hp * Hp * cbytes      # weight
                + 2 * Hp * 4                # bias
                + 2 * tb * Hp * obytes)     # output tiles
    vmem_limit = int(min(max(2 * vmem_est, 4 << 20), 48 << 20))

    cost = pl.CostEstimate(
        flops=2 * Bp * Hp * Hp,
        transcendentals=Bp * Hp,
        bytes_accessed=Bp * Hp * cbytes + Hp * Hp * cbytes + Hp * 4 + Bp * Hp * obytes,
    )

    out_p = pl.pallas_call(
        bert_pooler_kernel,
        out_shape=jax.ShapeDtypeStruct((Bp, Hp), out_dtype),
        grid=grid,
        in_specs=[
            pl.BlockSpec((tb, Hp), lambda i: (i, 0)),   # CLS tile, pipelined over batch
            pl.BlockSpec((Hp, Hp), lambda i: (0, 0)),   # weight: resident across tiles
            pl.BlockSpec((1, Hp), lambda i: (0, 0)),    # bias:   resident across tiles
        ],
        out_specs=pl.BlockSpec((tb, Hp), lambda i: (i, 0)),
        compiler_params=pltpu.CompilerParams(
            dimension_semantics=("parallel",),          # shard batch tiles across TCs (v7x)
            vmem_limit_bytes=vmem_limit,
        ),
        cost_estimate=cost,
    )(cls_p, w_p, b_p)

    return out_p[:B, :H]


if __name__ == "__main__":
    batch, seq, hidden = 2, 8, 32

    key = jax.random.PRNGKey(0)
    kx, kw, kb = jax.random.split(key, 3)

    # Deterministic synthetic parameters (shapes from nn.Linear(hidden, hidden)).
    x = jax.random.normal(kx, (batch, seq, hidden), dtype=jnp.float32)
    weight = jax.random.normal(kw, (hidden, hidden), dtype=jnp.float32) * 0.05
    bias = jax.random.normal(kb, (hidden,), dtype=jnp.float32) * 0.05

    out = jax.block_until_ready(bert_pooler(x, weight, bias))

    # Reference check (plain JAX, f32). bf16 MXU inputs (f32 accumulate) need a
    # looser tolerance than the pure-f32 path.
    ref = jnp.tanh(x[:, 0, :] @ weight.T + bias)
    assert out.shape == (batch, hidden)
    assert jnp.allclose(out, ref, atol=2e-2, rtol=2e-2), float(jnp.max(jnp.abs(out - ref)))

    print("KERNEL_OK")
</pallas_src>

<mosaic_0001>
module attributes {stable_mosaic.version = 11 : i64} {
  func.func @bert_pooler_kernel(%arg0: i32, %arg1: memref<16x128xbf16, #tpu.memory_space<vmem>>, %arg2: memref<128x128xbf16, #tpu.memory_space<vmem>>, %arg3: memref<1x128xf32, #tpu.memory_space<vmem>>, %arg4: memref<16x128xf32, #tpu.memory_space<vmem>>) attributes {dimension_semantics = [#tpu.dimension_semantics<parallel>], iteration_bounds = array<i64: 1>, scalar_prefetch = 0 : i64, scratch_operands = 0 : i64, tpu.core_type = #tpu.core_type<tc>, window_params = [{transform_indices = @transform_0, window_bounds = array<i64: 16, 128>}, {pipeline_mode = #tpu.pipeline_mode<synchronous>, transform_indices = @transform_1, window_bounds = array<i64: 128, 128>}, {pipeline_mode = #tpu.pipeline_mode<synchronous>, transform_indices = @transform_2, window_bounds = array<i64: 1, 128>}, {transform_indices = @transform_3, window_bounds = array<i64: 16, 128>}]} {
    %c0 = arith.constant 0 : index
    %c0_0 = arith.constant 0 : index
    %0 = vector.load %arg1[%c0, %c0_0] : memref<16x128xbf16, #tpu.memory_space<vmem>>, vector<16x128xbf16>
    %c0_1 = arith.constant 0 : index
    %c0_2 = arith.constant 0 : index
    %1 = vector.load %arg2[%c0_1, %c0_2] : memref<128x128xbf16, #tpu.memory_space<vmem>>, vector<128x128xbf16>
    %cst = arith.constant dense<0.000000e+00> : vector<16x128xf32>
    %2 = tpu.matmul %0, %1, %cst {dimension_numbers = #tpu.dot_dimension_numbers<[1], [1], [0], [0], [0, 0, 1, 0], [], []>} : vector<16x128xbf16>, vector<128x128xbf16>, vector<16x128xf32> -> vector<16x128xf32>
    %c0_3 = arith.constant 0 : index
    %c0_4 = arith.constant 0 : index
    %3 = vector.load %arg3[%c0_3, %c0_4] : memref<1x128xf32, #tpu.memory_space<vmem>>, vector<1x128xf32>
    %4 = vector.broadcast %3 : vector<1x128xf32> to vector<16x128xf32>
    %5 = arith.addf %2, %4 : vector<16x128xf32>
    %6 = math.tanh %5 : vector<16x128xf32>
    %c0_5 = arith.constant 0 : index
    %c0_6 = arith.constant 0 : index
    %7 = vector.load %arg4[%c0_5, %c0_6] : memref<16x128xf32, #tpu.memory_space<vmem>>, vector<16x128xf32>
    tpu.vector_store %arg4[%c0_5, %c0_6], %6 {strides = array<i32>} : memref<16x128xf32, #tpu.memory_space<vmem>>, vector<16x128xf32>,
    return
  }
  func.func @transform_0(%arg0: i32) -> (i32, i32) {
    %c0_i32 = arith.constant 0 : i32
    %c0_i32_0 = arith.constant 0 : i32
    return %arg0, %c0_i32 : i32, i32
  }
  func.func @transform_1(%arg0: i32) -> (i32, i32) {
    %c0_i32 = arith.constant 0 : i32
    %c0_i32_0 = arith.constant 0 : i32
    %c0_i32_1 = arith.constant 0 : i32
    return %c0_i32, %c0_i32_0 : i32, i32
  }
  func.func @transform_2(%arg0: i32) -> (i32, i32) {
    %c0_i32 = arith.constant 0 : i32
    %c0_i32_0 = arith.constant 0 : i32
    %c0_i32_1 = arith.constant 0 : i32
    return %c0_i32, %c0_i32_0 : i32, i32
  }
  func.func @transform_3(%arg0: i32) -> (i32, i32) {
    %c0_i32 = arith.constant 0 : i32
    %c0_i32_0 = arith.constant 0 : i32
    return %arg0, %c0_i32 : i32, i32
  }
}

</mosaic_0001>

<bundles_post_ra>
// kernel: tpu_custom_call.1
= control target key start
LH: loop header
LB: loop body
LE: loop exit
PB: predicated region body
PF: predicated region fallthrough
CT: control target
= control target key end

     0   :  { %8 = vsyncpa [#allocation3], 0  ;;  %s354_s0 = inlined_call_operand.hbm [shape: bf16[16,128], index: 0, kind: input, shape index: {}]   ;;  %s355_s1 = inlined_call_operand.hbm [shape: bf16[128,128], index: 1, kind: input, shape index: {}]   ;;  %s356_s2 = inlined_call_operand.vmem [shape: f32[1,128], index: 2, kind: input, shape index: {}]   ;;  %s357_s3 = inlined_call_operand.hbm [shape: f32[16,128], index: 3, kind: output, shape index: {}]  }
   0x1   :  { %9 = vsyncpa [#allocation6], 0 }
   0x2   :  { %10 = vsyncpa [#allocation4], 0  ;;  %s313_s12 = smov [#allocation2]  }
   0x3   :  { %s16_s13 = sshll.u32 %s313_s12, 4  ;;  %s17_s13 = int_to_ptr.vmem [resolvable:$true] %s16_s13 }
   0x4   :  { %s255_s14 = scalar_lea.vmem %s17_s13, 128  ;;  %p260_p1 = scmp.lt.s32.totalorder %s17_s13, %s17_s13 }
   0x5   :  { %p256_p0 = scmp.ne.s32.totalorder %s17_s13, %s255_s14  ;;  %p261_p2 = scmp.lt.s32.totalorder %s255_s14, %s255_s14 }
   0x7   :  { %p262_p3 = por %p261_p2, %p260_p1 }
   0x9   :  { %p263_p4 = pnand %p262_p3, %p256_p0 }
   0xb   :  { %266 = shalt.err (!%p263_p4)
}
   0xc   :  { %s314_s15 = smov 64   ;;  %s315_s16 = smov 4  }
   0xd   :  { %22 = dma.hbm_to_vmem [thread:$0]  %s354_s0, 128, %s17_s13, [#allocation3], %s314_s15, %s314_s15, %s315_s16  }
   0xe   :  { %s316_s19 = smov [#allocation5]  }
   0xf   :  { %s28_s20 = sshll.u32 %s316_s19, 4  ;;  %s29_s20 = int_to_ptr.vmem [resolvable:$true] %s28_s20 }
  0x10   :  { %s275_s21 = scalar_lea.vmem %s29_s20, 1024  ;;  %p280_p6 = scmp.lt.s32.totalorder %s29_s20, %s29_s20 }
  0x11   :  { %p276_p5 = scmp.ne.s32.totalorder %s29_s20, %s275_s21  ;;  %p281_p7 = scmp.lt.s32.totalorder %s275_s21, %s275_s21 }
  0x13   :  { %p282_p8 = por %p281_p7, %p280_p6 }
  0x15   :  { %p283_p9 = pnand %p282_p8, %p276_p5 }
  0x17   :  { %286 = shalt.err (!%p283_p9)
}
  0x18   :  { %34 = dma.hbm_to_vmem [thread:$0]  %s355_s1, 1024, %s29_s20, [#allocation6], %s314_s15, %s314_s15, %s315_s16  }
  0x19   :  { %307 = dma.done.wait [#allocation3], 128  }
  0x1a   :  { %308 = vsyncadd [#allocation3], 4294967168 }
  0x1b   :  { %309 = dma.done.wait [#allocation6], 1024  }
  0x1c   :  { %310 = vsyncadd [#allocation6], 4294966272  ;;  %v317_v0 = vmov 0.0   ;;  %vm318_vm0 = vmmov 0   ;;  %v234_v1 = vld [vmem:[#allocation5 + $0x38] sm:$0xff]   ;;  %v235_v2 = vld [vmem:[#allocation5 + $0x30] sm:$0xff]  }
  0x1d   :  { %205 = vmatprep.subr.bf16.mxu0 %v317_v0  ;;  %221 = vmatprep.mubr.msk.bf16.mxu0 %vm318_vm0, %v317_v0  ;;  %v236_v3 = vld [vmem:[#allocation5 + $0x28] sm:$0xff]   ;;  %v237_v4 = vld [vmem:[#allocation5 + $0x20] sm:$0xff]   ;;  %v238_v5 = vld [vmem:[#allocation5 + $0x18] sm:$0xff]   ;;  %s319_s24 = smov [#allocation7]  }
  0x1e   :  { %206 = vmatpush3.bf16.xpose.msra.mxu0 %v234_v1  ;;  %v239_v6 = vld [vmem:[#allocation5 + $0x10] sm:$0xff]   ;;  %v240_v7 = vld [vmem:[#allocation5 + $0x8] sm:$0xff]   ;;  %v241_v8 = vld [vmem:[#allocation5] sm:$0xff]   ;;  %s173_s25 = sshll.u32 %s319_s24, 4  ;;  %s174_s25 = int_to_ptr.vmem [resolvable:$true] %s173_s25 }
  0x1f   :  { %207 = vmatprep.subr.bf16.mxu0 %v317_v0  ;;  %v242_v9 = vld [vmem:[#allocation2] sm:$0xff]   ;;  %s287_s26 = scalar_lea.vmem %s174_s25, 256  ;;  %p292_p11 = scmp.lt.s32.totalorder %s174_s25, %s174_s25 }
  0x20   :  { %v186_v10 = vld [vmem:[%s356_s2] ss:$0 sm:$0xff]  ;;  %p288_p10 = scmp.ne.s32.totalorder %s174_s25, %s287_s26  ;;  %p293_p12 = scmp.lt.s32.totalorder %s287_s26, %s287_s26 }
  0x22   :  { %p294_p13 = por %p293_p12, %p292_p11 }
  0x24   :  { %p295_p0 = pnand %p294_p13, %p288_p10 }
  0x26   :  { %208 = vmatpush3.bf16.xpose.msra.mxu0 %v235_v2 }
  0x27   :  { %209 = vmatprep.subr.bf16.mxu0 %v317_v0 }
  0x2e   :  { %210 = vmatpush3.bf16.xpose.msra.mxu0 %v236_v3 }
  0x2f   :  { %211 = vmatprep.subr.bf16.mxu0 %v317_v0 }
  0x36   :  { %212 = vmatpush3.bf16.xpose.msra.mxu0 %v237_v4 }
  0x37   :  { %213 = vmatprep.subr.bf16.mxu0 %v317_v0 }
  0x3e   :  { %214 = vmatpush3.bf16.xpose.msra.mxu0 %v238_v5 }
  0x3f   :  { %215 = vmatprep.subr.bf16.mxu0 %v317_v0 }
  0x46   :  { %216 = vmatpush3.bf16.xpose.msra.mxu0 %v239_v6 }
  0x47   :  { %217 = vmatprep.subr.bf16.mxu0 %v317_v0 }
  0x4e   :  { %218 = vmatpush3.bf16.xpose.msra.mxu0 %v240_v7 }
  0x4f   :  { %219 = vmatprep.subr.bf16.mxu0 %v317_v0 }
  0x56   :  { %220 = vmatpush3.bf16.xpose.msra.mxu0 %v241_v8 }
  0x5d   :  { %222 = vmatmul.mubr.bf16.vlgmr.msra.gmra.mxu0 %v242_v9 }
 0x11d   :  { %v157_v11 = vpop.f32.mrf.mxu0 }
 0x11e   :  { %v158_v12 = vadd.f32 %v186_v10, %v157_v11 }
 0x11f   :  { %v223_v13 = vpop.f32.mrf.mxu0 }
 0x120   :  { %243 = vtanh.f32 %v158_v12 }
 0x121   :  { %v160_v14 = vpop.f32.mrf.mxu0 }
 0x122   :  { %v161_v15 = vadd.f32 %v186_v10, %v160_v14 }
 0x123   :  { %v224_v16 = vpop.f32.mrf.mxu0 }
 0x124   :  { %245 = vtanh.f32 %v161_v15 }
 0x12d   :  { %v244_v17 = vpop.eup %243 }
 0x12e   :  { %166 = vst [vmem:[#allocation7] sm:$0xff] %v244_v17 }
 0x131   :  { %v246_v18 = vpop.eup %245 }
 0x132   :  { %167 = vst [vmem:[#allocation7 + $0x8] sm:$0xff] %v246_v18 }
 0x133   :  { %298 = shalt.err (!%p295_p0)
}
 0x134   :  { %s320_s2 = smov 128   ;;  %s321_s27 = smov 8  }
 0x135   :  { %179 = dma.vmem_to_hbm [thread:$0]  %s174_s25, 256, %s357_s3, [#allocation4], %s320_s2, %s320_s2, %s321_s27  }
 0x136   :  { %311 = dma.done.wait [#allocation4], 256  }
 0x137   :  { %312 = vsyncadd [#allocation4], 4294967040 }
 0x138   :  { %183 = vsyncpa [#allocation3], 1 }
 0x139   :  { %184 = vsyncpa [#allocation6], 1 }
 0x13a   :  { %185 = vsyncpa [#allocation4], 1 }

</bundles_post_ra>
